<compile_context>
chip_gen: v7x
topology: tpu7x:2x2x1
jax: 0.10.0
libtpu: 0.0.40
codegen_flags: <defaults>
</compile_context>

<pallas_src>
import functools

import jax
import jax.numpy as jnp
import numpy as np
from jax import lax
from jax.experimental import pallas as pl
from jax.experimental.pallas import tpu as pltpu


# ---------------------------------------------------------------------------
# Kernel 1: scatter the learnable ctx rows into the pre-assembled prompts
# template (aliased input/output; prefix/suffix rows are never re-copied).
# ---------------------------------------------------------------------------
def _ctx_scatter_kernel(ctx_ref, tmpl_ref, out_ref, ctx_vmem, sems, *,
                        n_ctx, reps, n_rows_total):
    # ctx_ref : (T, n_ctx, D)  VMEM, resident across the grid
    # tmpl_ref: (N, L, D)      HBM, aliased with out_ref (data already there)
    # out_ref : (N, L, D)      HBM
    # ctx_vmem: (reps*T, n_ctx, D) VMEM scratch (the per-block ctx payload)
    # sems    : (2,) DMA semaphores (1-deep write pipeline)
    del tmpl_ref  # aliased with out_ref; prefix/suffix rows already in place
    i = pl.program_id(0)
    n = pl.num_programs(0)
    rows = ctx_vmem.shape[0]

    # Every row-block has identical content (each class gets the same T*n_ctx
    # ctx rows), so the payload is built once and reused for every DMA.
    @pl.when(i == 0)
    def _build_payload():
        ctx_vmem[...] = jnp.tile(ctx_ref[...], (reps, 1, 1))

    # Clamp the last block so a non-dividing n_cls still works; overlapping
    # writes are harmless because every block carries identical, T-aligned data.
    row0 = jnp.minimum(i * rows, n_rows_total - rows)
    slot = i % 2
    cur = pltpu.make_async_copy(
        ctx_vmem,
        out_ref.at[pl.ds(row0, rows), pl.ds(1, n_ctx), :],
        sems.at[slot])
    cur.start()

    # Wait for the DMA issued on the previous grid step (keep <=2 in flight).
    @pl.when(i > 0)
    def _wait_prev():
        pltpu.make_async_copy(
            ctx_vmem,
            out_ref.at[pl.ds(0, rows), pl.ds(1, n_ctx), :],
            sems.at[1 - slot]).wait()

    @pl.when(i == n - 1)
    def _drain():
        cur.wait()


def write_ctx_into_template(ctx, prompts_template, *, max_classes_per_block=32):
    """ctx: (T, n_ctx, D); prompts_template: (n_cls*T, L, D) with L = 1+n_ctx+S.

    Returns the full prompts array; only the [:, 1:1+n_ctx, :] rows are written
    (the template buffer is aliased to the output, so prefix/suffix rows cost
    zero HBM traffic)."""
    T, n_ctx, D = ctx.shape
    N, L, D2 = prompts_template.shape
    assert D2 == D and L >= 1 + n_ctx and N % T == 0
    n_cls = N // T

    # Small, VMEM-cheap payload blocks (<= ~0.5 MiB at production shapes) so
    # this fits every generation's scoped VMEM (incl. v5e's 16 MiB default).
    g = max(1, min(n_cls, max_classes_per_block))
    rows = g * T
    num_blocks = pl.cdiv(n_cls, g)

    kernel = functools.partial(_ctx_scatter_kernel, n_ctx=n_ctx, reps=g,
                               n_rows_total=N)
    bytes_accessed = T * n_ctx * D * 4 + N * n_ctx * D * 4
    return pl.pallas_call(
        kernel,
        out_shape=jax.ShapeDtypeStruct((N, L, D), prompts_template.dtype),
        grid=(num_blocks,),
        in_specs=[
            pl.BlockSpec((T, n_ctx, D), lambda i: (0, 0, 0)),   # tiny, resident
            pl.BlockSpec(memory_space=pl.ANY),                  # template (HBM)
        ],
        out_specs=pl.BlockSpec(memory_space=pl.ANY),            # prompts (HBM)
        scratch_shapes=[
            pltpu.VMEM((rows, n_ctx, D), prompts_template.dtype),
            pltpu.SemaphoreType.DMA((2,)),
        ],
        input_output_aliases={1: 0},                            # template -> prompts
        # sequential: step 0 builds the shared payload, sems pipeline across steps
        compiler_params=pltpu.CompilerParams(
            dimension_semantics=("arbitrary",)),
        cost_estimate=pl.CostEstimate(flops=0, transcendentals=0,
                                      bytes_accessed=bytes_accessed),
    )(ctx, prompts_template)


# ---------------------------------------------------------------------------
# Kernel 2: all Linear projections (shared proj + depth-1 compound projections)
# in a single grid step: one batched MXU matmul over the depth axis.
# ---------------------------------------------------------------------------
def _fused_proj_kernel(x_ref, w_ref, b_ref, o_ref):
    # x_ref: (depth, R, D) f32   w_ref: (depth, D, P) bf16   b_ref: (depth, 1, P) f32
    x = x_ref[...].astype(jnp.bfloat16)
    y = lax.dot_general(
        x, w_ref[...],
        dimension_numbers=(((2,), (1,)), ((0,), (0,))),
        preferred_element_type=jnp.float32)
    o_ref[...] = y + b_ref[...]


def fused_projections(x_stack, w_stack, b_stack):
    """x_stack: (depth,R,D) f32, w_stack: (depth,D,P) bf16, b_stack: (depth,1,P) f32."""
    depth, R, D = x_stack.shape
    P = w_stack.shape[2]
    flops = 2 * depth * R * D * P
    bytes_accessed = (x_stack.size * 4 + w_stack.size * 2 + b_stack.size * 4
                      + depth * R * P * 4)
    return pl.pallas_call(
        _fused_proj_kernel,
        out_shape=jax.ShapeDtypeStruct((depth, R, P), jnp.float32),
        grid=(1,),
        in_specs=[
            pl.BlockSpec((depth, R, D), lambda i: (0, 0, 0)),
            pl.BlockSpec((depth, D, P), lambda i: (0, 0, 0)),
            pl.BlockSpec((depth, 1, P), lambda i: (0, 0, 0)),
        ],
        out_specs=pl.BlockSpec((depth, R, P), lambda i: (0, 0, 0)),
        compiler_params=pltpu.CompilerParams(
            dimension_semantics=("arbitrary",),
            # headroom for production depths (<=12 layers of 512x768 bf16 weights)
            vmem_limit_bytes=48 * 1024 * 1024),
        cost_estimate=pl.CostEstimate(flops=flops, transcendentals=0,
                                      bytes_accessed=bytes_accessed),
    )(x_stack, w_stack, b_stack)


# ---------------------------------------------------------------------------
# One-time setup (OUTSIDE the hot path): prompts template + pre-stacked,
# pre-cast projection weights.  In training this runs once at module init.
# ---------------------------------------------------------------------------
def precompute_static_state(params):
    ctx = params["ctx"]
    _, n_ctx, D = ctx.shape
    prefix, suffix = params["token_prefix"], params["token_suffix"]
    N = prefix.shape[0]
    template = jnp.concatenate(
        [prefix, jnp.zeros((N, n_ctx, D), prefix.dtype), suffix], axis=1)
    w_stack = jnp.stack(
        [params["proj_w"]] + [w for w, _ in params["compound_proj"]], axis=0
    ).astype(jnp.bfloat16)                                     # (depth, D, P)
    b_stack = jnp.stack(
        [params["proj_b"]] + [b for _, b in params["compound_proj"]], axis=0
    )[:, None, :].astype(jnp.float32)                          # (depth, 1, P)
    return template, w_stack, b_stack


# ---------------------------------------------------------------------------
# Module forward (hot path).  The template is donated: the returned `prompts`
# buffer doubles as the next call's template (prefix/suffix rows untouched).
# ---------------------------------------------------------------------------
@functools.partial(jax.jit, donate_argnums=(1,))
def multimodal_prompt_learner_forward(ctx, prompts_template, compound_stack,
                                      w_stack, b_stack):
    T, n_ctx, D = ctx.shape
    depth = w_stack.shape[0]

    prompts = write_ctx_into_template(ctx, prompts_template)

    # Tiny activation stack (learnable params change every step, so this stays
    # in the forward); bf16 cast happens inside the kernel.
    x_stack = jnp.concatenate([ctx[None], compound_stack], axis=0)
    x_stack = x_stack.reshape(depth, T * n_ctx, D)

    out = fused_projections(x_stack, w_stack, b_stack)          # (depth, T*n_ctx, P)
    out = out.reshape(depth, T, n_ctx, -1)

    shared_ctx = out[0]
    visual_deep_prompts = [out[1 + i] for i in range(depth - 1)]
    compound_prompts_text = [compound_stack[i] for i in range(depth - 1)]
    return prompts, shared_ctx, compound_prompts_text, visual_deep_prompts


# ---------------------------------------------------------------------------
# Deterministic parameter construction (synthetic, scaled-down shapes)
# ---------------------------------------------------------------------------
def make_params(key, *, n_cls, n_ctx, text_prompts_number, ctx_dim, vis_dim,
                seq_len, depth):
    T = text_prompts_number
    N = n_cls * T
    S = seq_len - 1 - n_ctx
    ks = jax.random.split(key, 8 + 2 * (depth - 1))

    params = {
        # nn.init.normal_(std=0.02)
        "ctx": 0.02 * jax.random.normal(ks[0], (T, n_ctx, ctx_dim), jnp.float32),
        # frozen CLIP token embeddings (synthetic here)
        "token_prefix": jax.random.normal(ks[1], (N, 1, ctx_dim), jnp.float32),
        "token_suffix": jax.random.normal(ks[2], (N, S, ctx_dim), jnp.float32),
        # self.proj = nn.Linear(ctx_dim, 768)   (768 -> vis_dim here)
        "proj_w": 0.02 * jax.random.normal(ks[3], (ctx_dim, vis_dim), jnp.float32),
        "proj_b": 0.02 * jax.random.normal(ks[4], (vis_dim,), jnp.float32),
    }
    params["compound_prompts_text"] = [
        0.02 * jax.random.normal(ks[5 + i], (T, n_ctx, ctx_dim), jnp.float32)
        for i in range(depth - 1)
    ]
    base = 5 + (depth - 1)
    params["compound_proj"] = [
        (
            0.02 * jax.random.normal(ks[base + 2 * i], (ctx_dim, vis_dim), jnp.float32),
            0.02 * jax.random.normal(ks[base + 2 * i + 1], (vis_dim,), jnp.float32),
        )
        for i in range(depth - 1)
    ]
    return params


# ---------------------------------------------------------------------------
# Plain-JAX reference for correctness checking (bf16 inputs, f32 accumulation)
# ---------------------------------------------------------------------------
def reference_forward(params, n_cls):
    ctx = params["ctx"]
    T, n_ctx, D = ctx.shape
    ctx_exp = jnp.broadcast_to(ctx[None], (n_cls, T, n_ctx, D)).reshape(
        n_cls * T, n_ctx, D)
    prompts = jnp.concatenate(
        [params["token_prefix"], ctx_exp, params["token_suffix"]], axis=1)

    def proj(x, w, b):
        xf = x.astype(jnp.bfloat16).astype(jnp.float32)
        wf = w.astype(jnp.bfloat16).astype(jnp.float32)
        return jnp.einsum("tnd,dp->tnp", xf, wf,
                          precision=jax.lax.Precision.HIGHEST) + b.astype(jnp.float32)

    shared_ctx = proj(ctx, params["proj_w"], params["proj_b"])
    visual = [
        proj(p, w, b)
        for p, (w, b) in zip(params["compound_prompts_text"], params["compound_proj"])
    ]
    return prompts, shared_ctx, params["compound_prompts_text"], visual


if __name__ == "__main__":
    # Small, consistent shapes (production: ctx_dim=512, vis_dim=768, seq_len=77):
    n_cls, n_ctx, T = 4, 4, 2
    ctx_dim, vis_dim, seq_len, depth = 128, 256, 16, 3

    params = make_params(jax.random.PRNGKey(0),
                         n_cls=n_cls, n_ctx=n_ctx, text_prompts_number=T,
                         ctx_dim=ctx_dim, vis_dim=vis_dim,
                         seq_len=seq_len, depth=depth)

    # Init-time precompute (hoisted out of the hot forward path).
    template, w_stack, b_stack = precompute_static_state(params)
    compound_stack = jnp.stack(params["compound_prompts_text"], axis=0)

    # Reference first (template buffer is donated by the Pallas forward).
    r_prompts, r_shared, r_compound, r_visual = reference_forward(params, n_cls)

    prompts, shared_ctx, compound, visual = multimodal_prompt_learner_forward(
        params["ctx"], template, compound_stack, w_stack, b_stack)
    jax.block_until_ready((prompts, shared_ctx, compound, visual))

    np.testing.assert_allclose(np.asarray(prompts), np.asarray(r_prompts),
                               rtol=0, atol=0)
    np.testing.assert_allclose(np.asarray(shared_ctx), np.asarray(r_shared),
                               rtol=1e-4, atol=1e-5)
    for v, rv in zip(visual, r_visual):
        np.testing.assert_allclose(np.asarray(v), np.asarray(rv),
                                   rtol=1e-4, atol=1e-5)
    for c, rc in zip(compound, r_compound):
        np.testing.assert_allclose(np.asarray(c), np.asarray(rc), rtol=0, atol=0)

    assert prompts.shape == (n_cls * T, seq_len, ctx_dim)
    assert shared_ctx.shape == (T, n_ctx, vis_dim)
    assert len(visual) == depth - 1 and visual[0].shape == (T, n_ctx, vis_dim)

    print("KERNEL_OK")
</pallas_src>

<mosaic_0001>
module attributes {stable_mosaic.version = 11 : i64} {
  func.func @_fused_proj_kernel(%arg0: i32, %arg1: memref<3x8x128xf32, #tpu.memory_space<vmem>>, %arg2: memref<3x128x256xbf16, #tpu.memory_space<vmem>>, %arg3: memref<3x1x256xf32, #tpu.memory_space<vmem>>, %arg4: memref<3x8x256xf32, #tpu.memory_space<vmem>>) attributes {dimension_semantics = [#tpu.dimension_semantics<arbitrary>], iteration_bounds = array<i64: 1>, scalar_prefetch = 0 : i64, scratch_operands = 0 : i64, tpu.core_type = #tpu.core_type<tc>, window_params = [{pipeline_mode = #tpu.pipeline_mode<synchronous>, transform_indices = @transform_0, window_bounds = array<i64: 3, 8, 128>}, {pipeline_mode = #tpu.pipeline_mode<synchronous>, transform_indices = @transform_1, window_bounds = array<i64: 3, 128, 256>}, {pipeline_mode = #tpu.pipeline_mode<synchronous>, transform_indices = @transform_2, window_bounds = array<i64: 3, 1, 256>}, {pipeline_mode = #tpu.pipeline_mode<synchronous>, transform_indices = @transform_3, window_bounds = array<i64: 3, 8, 256>}]} {
    %c0 = arith.constant 0 : index
    %c0_0 = arith.constant 0 : index
    %c0_1 = arith.constant 0 : index
    %0 = vector.load %arg1[%c0, %c0_0, %c0_1] : memref<3x8x128xf32, #tpu.memory_space<vmem>>, vector<3x8x128xf32>
    %1 = arith.truncf %0 : vector<3x8x128xf32> to vector<3x8x128xbf16>
    %c0_2 = arith.constant 0 : index
    %c0_3 = arith.constant 0 : index
    %c0_4 = arith.constant 0 : index
    %2 = vector.load %arg2[%c0_2, %c0_3, %c0_4] : memref<3x128x256xbf16, #tpu.memory_space<vmem>>, vector<3x128x256xbf16>
    %cst = arith.constant dense<0.000000e+00> : vector<3x8x256xf32>
    %3 = tpu.matmul %1, %2, %cst {dimension_numbers = #tpu.dot_dimension_numbers<[2], [1], [1], [2], [0, 0, 0, 1, 1, 2], [0], [0]>} : vector<3x8x128xbf16>, vector<3x128x256xbf16>, vector<3x8x256xf32> -> vector<3x8x256xf32>
    %c0_5 = arith.constant 0 : index
    %c0_6 = arith.constant 0 : index
    %c0_7 = arith.constant 0 : index
    %4 = vector.load %arg3[%c0_5, %c0_6, %c0_7] : memref<3x1x256xf32, #tpu.memory_space<vmem>>, vector<3x1x256xf32>
    %5 = vector.broadcast %4 : vector<3x1x256xf32> to vector<3x8x256xf32>
    %6 = arith.addf %3, %5 : vector<3x8x256xf32>
    %c0_8 = arith.constant 0 : index
    %c0_9 = arith.constant 0 : index
    %c0_10 = arith.constant 0 : index
    %7 = vector.load %arg4[%c0_8, %c0_9, %c0_10] : memref<3x8x256xf32, #tpu.memory_space<vmem>>, vector<3x8x256xf32>
    tpu.vector_store %arg4[%c0_8, %c0_9, %c0_10], %6 {strides = array<i32>} : memref<3x8x256xf32, #tpu.memory_space<vmem>>, vector<3x8x256xf32>,
    return
  }
  func.func @transform_0(%arg0: i32) -> (i32, i32, i32) {
    %c0_i32 = arith.constant 0 : i32
    %c0_i32_0 = arith.constant 0 : i32
    %c0_i32_1 = arith.constant 0 : i32
    %c0_i32_2 = arith.constant 0 : i32
    return %c0_i32, %c0_i32_0, %c0_i32_1 : i32, i32, i32
  }
  func.func @transform_1(%arg0: i32) -> (i32, i32, i32) {
    %c0_i32 = arith.constant 0 : i32
    %c0_i32_0 = arith.constant 0 : i32
    %c0_i32_1 = arith.constant 0 : i32
    %c0_i32_2 = arith.constant 0 : i32
    return %c0_i32, %c0_i32_0, %c0_i32_1 : i32, i32, i32
  }
  func.func @transform_2(%arg0: i32) -> (i32, i32, i32) {
    %c0_i32 = arith.constant 0 : i32
    %c0_i32_0 = arith.constant 0 : i32
    %c0_i32_1 = arith.constant 0 : i32
    %c0_i32_2 = arith.constant 0 : i32
    return %c0_i32, %c0_i32_0, %c0_i32_1 : i32, i32, i32
  }
  func.func @transform_3(%arg0: i32) -> (i32, i32, i32) {
    %c0_i32 = arith.constant 0 : i32
    %c0_i32_0 = arith.constant 0 : i32
    %c0_i32_1 = arith.constant 0 : i32
    %c0_i32_2 = arith.constant 0 : i32
    return %c0_i32, %c0_i32_0, %c0_i32_1 : i32, i32, i32
  }
}

module attributes {stable_mosaic.version = 11 : i64} {
  func.func @_ctx_scatter_kernel(%arg0: i32, %arg1: memref<2x4x128xf32, #tpu.memory_space<vmem>>, %arg2: memref<8x16x128xf32, #tpu.memory_space<any>>, %arg3: memref<8x16x128xf32, #tpu.memory_space<any>>, %arg4: memref<8x4x128xf32, #tpu.memory_space<vmem>>, %arg5: memref<2x!tpu.dma_semaphore, #tpu.memory_space<semaphore_mem>>) attributes {dimension_semantics = [#tpu.dimension_semantics<arbitrary>], iteration_bounds = array<i64: 1>, scalar_prefetch = 0 : i64, scratch_operands = 2 : i64, tpu.core_type = #tpu.core_type<tc>, window_params = [{pipeline_mode = #tpu.pipeline_mode<synchronous>, transform_indices = @transform_0, window_bounds = array<i64: 2, 4, 128>}, {}, {}]} {
    %c0_i32 = arith.constant 0 : i32
    %0 = arith.cmpi eq, %arg0, %c0_i32 : i32
    %1 = arith.extui %0 : i1 to i32
    %c0_i32_0 = arith.constant 0 : i32
    %2 = arith.cmpi ne, %1, %c0_i32_0 : i32
    scf.if %2 {
      %c0 = arith.constant 0 : index
      %c0_12 = arith.constant 0 : index
      %c0_13 = arith.constant 0 : index
      %24 = vector.load %arg1[%c0, %c0_12, %c0_13] : memref<2x4x128xf32, #tpu.memory_space<vmem>>, vector<2x4x128xf32>
      %25 = tpu.concatenate %24, %24, %24, %24 in 0 : vector<2x4x128xf32>, vector<2x4x128xf32>, vector<2x4x128xf32>, vector<2x4x128xf32> -> vector<8x4x128xf32>
      %c0_14 = arith.constant 0 : index
      %c0_15 = arith.constant 0 : index
      %c0_16 = arith.constant 0 : index
      %26 = vector.load %arg4[%c0_14, %c0_15, %c0_16] : memref<8x4x128xf32, #tpu.memory_space<vmem>>, vector<8x4x128xf32>
      tpu.vector_store %arg4[%c0_14, %c0_15, %c0_16], %25 {strides = array<i32>} : memref<8x4x128xf32, #tpu.memory_space<vmem>>, vector<8x4x128xf32>,
    } else {
    }
    %c8_i32 = arith.constant 8 : i32
    %3 = arith.muli %arg0, %c8_i32 : i32
    %c0_i32_1 = arith.constant 0 : i32
    %4 = arith.minsi %3, %c0_i32_1 : i32
    %c2_i32 = arith.constant 2 : i32
    %c0_i32_2 = arith.constant 0 : i32
    %5 = arith.cmpi eq, %c2_i32, %c0_i32_2 : i32
    %c1_i32 = arith.constant 1 : i32
    %6 = arith.select %5, %c1_i32, %c2_i32 : i32
    %7 = arith.remsi %arg0, %6 : i32
    %c0_i32_3 = arith.constant 0 : i32
    %8 = arith.cmpi ne, %7, %c0_i32_3 : i32
    %c0_i32_4 = arith.constant 0 : i32
    %9 = arith.cmpi slt, %7, %c0_i32_4 : i32
    %c0_i32_5 = arith.constant 0 : i32
    %10 = arith.cmpi slt, %6, %c0_i32_5 : i32
    %11 = arith.xori %9, %10 : i1
    %12 = arith.andi %11, %8 : i1
    %13 = arith.addi %7, %6 : i32
    %14 = arith.select %12, %13, %7 : i32
    %c1_i32_6 = arith.constant 1 : i32
    %c0_i32_7 = arith.constant 0 : i32
    %15 = tpu.memref_slice %arg3[%4, %c1_i32_6, %c0_i32_7] : memref<8x16x128xf32, #tpu.memory_space<any>> -> memref<8x4x128xf32, #tpu.memory_space<any>>
    %16 = tpu.memref_slice %arg5[%14] : memref<2x!tpu.dma_semaphore, #tpu.memory_space<semaphore_mem>> -> memref<1x!tpu.dma_semaphore, #tpu.memory_space<semaphore_mem>>
    %17 = tpu.memref_squeeze %16 : memref<1x!tpu.dma_semaphore, #tpu.memory_space<semaphore_mem>> -> memref<!tpu.dma_semaphore, #tpu.memory_space<semaphore_mem>>
    tpu.enqueue_dma source(%arg4 : memref<8x4x128xf32, #tpu.memory_space<vmem>>) target(%15 : memref<8x4x128xf32, #tpu.memory_space<any>>) target_semaphore(%17 : memref<!tpu.dma_semaphore, #tpu.memory_space<semaphore_mem>>)
    %c0_i32_8 = arith.constant 0 : i32
    %18 = arith.cmpi sgt, %arg0, %c0_i32_8 : i32
    %19 = arith.extui %18 : i1 to i32
    %c0_i32_9 = arith.constant 0 : i32
    %20 = arith.cmpi ne, %19, %c0_i32_9 : i32
    scf.if %20 {
      %c1_i32_12 = arith.constant 1 : i32
      %24 = arith.subi %c1_i32_12, %14 : i32
      %c0_i32_13 = arith.constant 0 : i32
      %c1_i32_14 = arith.constant 1 : i32
      %c0_i32_15 = arith.constant 0 : i32
      %25 = tpu.memref_slice %arg3[%c0_i32_13, %c1_i32_14, %c0_i32_15] : memref<8x16x128xf32, #tpu.memory_space<any>> -> memref<8x4x128xf32, #tpu.memory_space<any>>
      %26 = tpu.memref_slice %arg5[%24] : memref<2x!tpu.dma_semaphore, #tpu.memory_space<semaphore_mem>> -> memref<1x!tpu.dma_semaphore, #tpu.memory_space<semaphore_mem>>
      %27 = tpu.memref_squeeze %26 : memref<1x!tpu.dma_semaphore, #tpu.memory_space<semaphore_mem>> -> memref<!tpu.dma_semaphore, #tpu.memory_space<semaphore_mem>>
      tpu.wait_dma2 semaphore(%27 : memref<!tpu.dma_semaphore, #tpu.memory_space<semaphore_mem>>) src(%arg4 : memref<8x4x128xf32, #tpu.memory_space<vmem>>) dst(%25 : memref<8x4x128xf32, #tpu.memory_space<any>>)
    } else {
    }
    %c0_i32_10 = arith.constant 0 : i32
    %21 = arith.cmpi eq, %arg0, %c0_i32_10 : i32
    %22 = arith.extui %21 : i1 to i32
    %c0_i32_11 = arith.constant 0 : i32
    %23 = arith.cmpi ne, %22, %c0_i32_11 : i32
    scf.if %23 {
      %c1_i32_12 = arith.constant 1 : i32
      %c0_i32_13 = arith.constant 0 : i32
      %24 = tpu.memref_slice %arg3[%4, %c1_i32_12, %c0_i32_13] : memref<8x16x128xf32, #tpu.memory_space<any>> -> memref<8x4x128xf32, #tpu.memory_space<any>>
      %25 = tpu.memref_slice %arg5[%14] : memref<2x!tpu.dma_semaphore, #tpu.memory_space<semaphore_mem>> -> memref<1x!tpu.dma_semaphore, #tpu.memory_space<semaphore_mem>>
      %26 = tpu.memref_squeeze %25 : memref<1x!tpu.dma_semaphore, #tpu.memory_space<semaphore_mem>> -> memref<!tpu.dma_semaphore, #tpu.memory_space<semaphore_mem>>
      tpu.wait_dma2 semaphore(%26 : memref<!tpu.dma_semaphore, #tpu.memory_space<semaphore_mem>>) src(%arg4 : memref<8x4x128xf32, #tpu.memory_space<vmem>>) dst(%24 : memref<8x4x128xf32, #tpu.memory_space<any>>)
    } else {
    }
    return
  }
  func.func @transform_0(%arg0: i32) -> (i32, i32, i32) {
    %c0_i32 = arith.constant 0 : i32
    %c0_i32_0 = arith.constant 0 : i32
    %c0_i32_1 = arith.constant 0 : i32
    %c0_i32_2 = arith.constant 0 : i32
    return %c0_i32, %c0_i32_0, %c0_i32_1 : i32, i32, i32
  }
}

</mosaic_0001>

<bundles_post_ra>
// kernel: squeeze.5
= control target key start
LH: loop header
LB: loop body
LE: loop exit
PB: predicated region body
PF: predicated region fallthrough
CT: control target
= control target key end

     0   :  { %2 = vsyncpa [#allocation1], 0  ;;  %s103_s0 = inlined_call_operand.vmem [shape: f32[1,8,256], index: 0, kind: input, shape index: {}]   ;;  %s104_s1 = inlined_call_operand.hbm [shape: f32[2,4,256], index: 1, kind: output, shape index: {}]  }
   0x1   :  { %v3_v0 = vld [vmem:[%s103_s0] sm:$0xff]   ;;  %v48_v1 = vld [vmem:[%s103_s0 + $0x8] sm:$0xff]   ;;  %s74_s0 = smov [#allocation0]  }
   0x2   :  { %4 = vst [vmem:[#allocation2] sm:$0xf] %v3_v0   ;;  %6 = vst [vmem:[#allocation2 + $0xc] sm:$0xf0] %v3_v0   ;;  %s40_s10 = sshll.u32 %s74_s0, 4  ;;  %s41_s10 = int_to_ptr.vmem [resolvable:$true] %s40_s10 }
   0x3   :  { %10 = vst [vmem:[#allocation2 + $0x8] sm:$0xf] %v48_v1   ;;  %12 = vst [vmem:[#allocation2 + $0x14] sm:$0xf0] %v48_v1   ;;  %s50_s11 = scalar_lea.vmem %s41_s10, 256  ;;  %p55_p1 = scmp.lt.s32.totalorder %s41_s10, %s41_s10 }
   0x4   :  { %p51_p0 = scmp.ne.s32.totalorder %s41_s10, %s50_s11  ;;  %p56_p2 = scmp.lt.s32.totalorder %s50_s11, %s50_s11 }
   0x6   :  { %p57_p3 = por %p56_p2, %p55_p1 }
   0x8   :  { %p58_p4 = pnand %p57_p3, %p51_p0 }
   0x9   :  { %v16_v2 = vld [vmem:[#allocation2] sm:$0xf]  ;;  %v25_v4 = vld [vmem:[#allocation2 + $0x10] sm:$0xf] }
   0xa   :  { %v20_v3 = vld [vmem:[#allocation2 + $0x8] sm:$0xf]  ;;  %18 = vst [vmem:[#allocation0] sm:$0xf] %v16_v2  ;;  %29 = vst [vmem:[#allocation0 + $0x8] sm:$0xf] %v25_v4 }
   0xb   :  { %23 = vst [vmem:[#allocation0 + $0x4] sm:$0xf] %v20_v3  ;;  %v31_v5 = vld [vmem:[#allocation2 + $0x18] sm:$0xf] }
   0xc   :  { %35 = vst [vmem:[#allocation0 + $0xc] sm:$0xf] %v31_v5 }
   0xd   :  { %61 = shalt.err (!%p58_p4)
}
   0xe   :  { %s62_s14 = scalar_lea.hbm %s104_s1, 256 }
   0xf   :  { %p63_p5 = scmp.ne.s32.totalorder %s104_s1, %s62_s14  ;;  %p66_p6 = scmp.lt.u32.totalorder %s62_s14, %s104_s1 }
  0x11   :  { %p68_p7 = pnand %p66_p6, %p63_p5 }
  0x13   :  { %71 = shalt.err (!%p68_p7)
}
  0x14   :  { %43 = dma.vmem_to_hbm [thread:$0]  %s41_s10, 256, %s104_s1, [#allocation1]  }
  0x15   :  { %72 = dma.done.wait [#allocation1], 256  }
  0x16   :  { %73 = vsyncadd [#allocation1], 4294967040 }
  0x17   :  { %45 = vsyncpa [#allocation1], 1 }

// kernel: multimodal_prompt_learner_forward.2
= control target key start
LH: loop header
LB: loop body
LE: loop exit
PB: predicated region body
PF: predicated region fallthrough
CT: control target
= control target key end

     0   :  { %s113_s16 = smov [#allocation2]   ;;  %s156_s0 = inlined_call_operand.vmem [shape: f32[2,4,128], index: 0, kind: input, shape index: {}]   ;;  %s157_s1 = inlined_call_operand.hbm [shape: f32[8,16,128], index: 1, kind: input, shape index: {}, may-alias: {1,2}]   ;;  %s158_s2 = inlined_call_operand.hbm [shape: f32[8,16,128], index: 2, kind: output, shape index: {}, may-alias: {1,2}]  }
   0x1   :  { %v13_v0 = vld [vmem:[%s156_s0] sm:$0xf]  ;;  %v14_v1 = vld [vmem:[%s156_s0 + $0x4] sm:$0xf]  ;;  %s141_s15 = scalar_lea.hbm %s158_s2, 16  ;;  %s40_s17 = sshll.u32 %s113_s16, 4  ;;  %s41_s17 = int_to_ptr.vmem [resolvable:$true] %s40_s17 }
   0x2   :  { %15 = vst [vmem:[#allocation2] sm:$0xf] %v13_v0  ;;  %17 = vst [vmem:[#allocation2 + $0x8] sm:$0xf] %v13_v0  ;;  %s86_s1 = scalar_lea.vmem %s41_s17, 512  ;;  %p91_p1 = scmp.lt.s32.totalorder %s41_s17, %s41_s17 }
   0x3   :  { %19 = vst [vmem:[#allocation2 + $0x10] sm:$0xf] %v13_v0  ;;  %21 = vst [vmem:[#allocation2 + $0x18] sm:$0xf] %v13_v0  ;;  %p87_p0 = scmp.ne.s32.totalorder %s41_s17, %s86_s1  ;;  %p92_p2 = scmp.lt.s32.totalorder %s86_s1, %s86_s1 }
   0x4   :  { %16 = vst [vmem:[#allocation2 + $0x4] sm:$0xf] %v14_v1  ;;  %18 = vst [vmem:[#allocation2 + $0xc] sm:$0xf] %v14_v1 }
   0x5   :  { %20 = vst [vmem:[#allocation2 + $0x14] sm:$0xf] %v14_v1  ;;  %22 = vst [vmem:[#allocation2 + $0x1c] sm:$0xf] %v14_v1  ;;  %p93_p3 = por %p92_p2, %p91_p1 }
   0x7   :  { %p94_p4 = pnand %p93_p3, %p87_p0 }
   0x9   :  { %97 = shalt.err (!%p94_p4)  }
   0xa   :  { %s110_s19 = scalar_lea.hbm %s158_s2, 528  ;;  %s100_s22 = scalar_lea.hbm %s158_s2, 2048 }
   0xb   :  { %p99_p5 = scmp.ne.s32.totalorder %s141_s15, %s110_s19  ;;  %p101_p6 = scmp.lt.u32.totalorder %s141_s15, %s158_s2 }
   0xc   :  { %p102_p7 = scmp.lt.u32.totalorder %s100_s22, %s110_s19  ;;  %p104_p9 = scmp.lt.u32.totalorder %s110_s19, %s141_s15 }
   0xe   :  { %p103_p8 = por %p102_p7, %p101_p6 }
  0x10   :  { %p105_p10 = por %p104_p9, %p103_p8 }
  0x12   :  { %p106_p11 = pnand %p105_p10, %p99_p5 }
  0x14   :  { %109 = shalt.err (!%p106_p11)  }
  0x15   :  { %s114_s25 = smov 64   ;;  %s115_s26 = smov 256  }
  0x16   :  { %s116_s27 = smov 4  }
  0x17   :  { %43 = dma.vmem_to_hbm [thread:$0]  %s41_s17, 512, %s141_s15, [#allocation3], %s114_s25, %s115_s26, %s116_s27 }
  0x18   :  { %111 = dma.done.wait [#allocation3], 512 }
  0x19   :  { %112 = vsyncadd [#allocation3], 4294966784 }
  0x1a   :  { %61 = vsyncmov [#allocation3] }
  0x1d   :  { %s62_s28 = vpop.sfrf %61 }
  0x1e   :  { %p80_p12 = scmp.ne.s32.totalorder %s62_s28, 0 }
  0x20   :  { %66 = shalt.err (%p80_p12)  }
  0x21   :  { %68 = vsyncmov [#allocation3 + $0x1] }
  0x24   :  { %s69_s29 = vpop.sfrf %68 }
  0x25   :  { %p81_p13 = scmp.ne.s32.totalorder %s69_s29, 0 }
  0x27   :  { %73 = shalt.err (%p81_p13)  }

// kernel: multimodal_prompt_learner_forward.3
= control target key start
LH: loop header
LB: loop body
LE: loop exit
PB: predicated region body
PF: predicated region fallthrough
CT: control target
= control target key end

     0   :  { %8 = vsyncpa [#allocation3], 0  ;;  %s641_s12 = smov [#allocation2]   ;;  %s716_s0 = inlined_call_operand.vmem [shape: f32[3,8,128], index: 0, kind: input, shape index: {}]   ;;  %s717_s1 = inlined_call_operand.hbm [shape: bf16[3,128,256], index: 1, kind: input, shape index: {}]   ;;  %s718_s2 = inlined_call_operand.vmem [shape: f32[3,1,256], index: 2, kind: input, shape index: {}]   ;;  %s719_s3 = inlined_call_operand.vmem [shape: f32[3,8,256], index: 3, kind: output, shape index: {}]  }
   0x1   :  { %s16_s13 = sshll.u32 %s641_s12, 4  ;;  %s617_s16 = scalar_lea.hbm %s717_s1, 6144  ;;  %s17_s13 = int_to_ptr.vmem [resolvable:$true] %s16_s13 }
   0x2   :  { %p618_p0 = scmp.ne.s32.totalorder %s717_s1, %s617_s16  ;;  %p621_p1 = scmp.lt.u32.totalorder %s617_s16, %s717_s1 }
   0x4   :  { %p623_p2 = pnand %p621_p1, %p618_p0 }
   0x6   :  { %626 = shalt.err (!%p623_p2)
}
   0x7   :  { %s627_s21 = scalar_lea.vmem %s17_s13, 6144  ;;  %p632_p4 = scmp.lt.s32.totalorder %s17_s13, %s17_s13 }
   0x8   :  { %p628_p3 = scmp.ne.s32.totalorder %s17_s13, %s627_s21  ;;  %p633_p5 = scmp.lt.s32.totalorder %s627_s21, %s627_s21 }
   0xa   :  { %p634_p6 = por %p633_p5, %p632_p4 }
   0xc   :  { %p635_p7 = pnand %p634_p6, %p628_p3 }
   0xe   :  { %638 = shalt.err (!%p635_p7)
}
   0xf   :  { %s642_s22 = smov 128   ;;  %s643_s23 = smov 8  }
  0x10   :  { %22 = dma.hbm_to_vmem [thread:$0]  %s717_s1, 6144, %s17_s13, [#allocation3], %s642_s22, %s642_s22, %s643_s23  }
  0x11   :  { %639 = dma.done.wait [#allocation3], 6144  }
  0x12   :  { %640 = vsyncadd [#allocation3], 4294961152  ;;  %v644_v0 = vmov 0   ;;  %v545_v1 = vld [vmem:[#allocation2 + $0x4] ss:$8 sps:$4 sm:$0xff]   ;;  %v31_v53 = vld [vmem:[%s716_s0 + $0x10] sm:$0xff]  ;;  %v89_v55 = vlaneseq }
  0x13   :  { %231 = vmatprep.mubr.bf16.mxu0 %v644_v0  ;;  %352 = vmatprep.mubr.bf16.mxu1 %v644_v0  ;;  %v547_v2 = vld [vmem:[#allocation2] ss:$8 sps:$4 sm:$0xff]   ;;  %v548_v3 = vld [vmem:[#allocation2 + $0x14] ss:$8 sps:$4 sm:$0xff]   ;;  %v550_v4 = vld [vmem:[#allocation2 + $0x10] ss:$8 sps:$4 sm:$0xff]   ;;  %v34_v54 = vpack.c.bf16 %v31_v53, %v31_v53 }
  0x14   :  { %199 = vmatprep.subr.bf16.mxu0 %v545_v1  ;;  %v551_v5 = vld [vmem:[#allocation2 + $0x24] ss:$8 sps:$4 sm:$0xff]   ;;  %v553_v6 = vld [vmem:[#allocation2 + $0x20] ss:$8 sps:$4 sm:$0xff]   ;;  %v554_v7 = vld [vmem:[#allocation2 + $0x34] ss:$8 sps:$4 sm:$0xff]  }
  0x15   :  { %200 = vmatpush1.bf16.msra.mxu0 %v547_v2  ;;  %v556_v8 = vld [vmem:[#allocation2 + $0x30] ss:$8 sps:$4 sm:$0xff]   ;;  %v569_v9 = vld [vmem:[#allocation2 + $0x84] ss:$8 sps:$4 sm:$0xff]   ;;  %v571_v10 = vld [vmem:[#allocation2 + $0x80] ss:$8 sps:$4 sm:$0xff]  }
  0x16   :  { %201 = vmatprep.subr.bf16.mxu0 %v548_v3  ;;  %v557_v11 = vld [vmem:[#allocation2 + $0x44] ss:$8 sps:$4 sm:$0xff]   ;;  %320 = vmatprep.subr.bf16.mxu1 %v569_v9  ;;  %v575_v12 = vld [vmem:[#allocation2 + $0x94] ss:$8 sps:$4 sm:$0xff]   ;;  %v577_v13 = vld [vmem:[#allocation2 + $0x90] ss:$8 sps:$4 sm:$0xff]  }
  0x17   :  { %321 = vmatpush1.bf16.msra.mxu1 %v571_v10  ;;  %v559_v14 = vld [vmem:[#allocation2 + $0x40] ss:$8 sps:$4 sm:$0xff]   ;;  %v560_v15 = vld [vmem:[#allocation2 + $0x54] ss:$8 sps:$4 sm:$0xff]   ;;  %v581_v16 = vld [vmem:[#allocation2 + $0xa4] ss:$8 sps:$4 sm:$0xff]  }
  0x18   :  { %322 = vmatprep.subr.bf16.mxu1 %v575_v12  ;;  %v562_v17 = vld [vmem:[#allocation2 + $0x50] ss:$8 sps:$4 sm:$0xff]   ;;  %v583_v18 = vld [vmem:[#allocation2 + $0xa0] ss:$8 sps:$4 sm:$0xff]   ;;  %v587_v19 = vld [vmem:[#allocation2 + $0xb4] ss:$8 sps:$4 sm:$0xff]  }
  0x19   :  { %202 = vmatpush1.bf16.msra.mxu0 %v550_v4  ;;  %v563_v20 = vld [vmem:[#allocation2 + $0x64] ss:$8 sps:$4 sm:$0xff]   ;;  %v565_v21 = vld [vmem:[#allocation2 + $0x60] ss:$8 sps:$4 sm:$0xff]   ;;  %v589_v22 = vld [vmem:[#allocation2 + $0xb0] ss:$8 sps:$4 sm:$0xff]  }
  0x1a   :  { %203 = vmatprep.subr.bf16.mxu0 %v551_v5  ;;  %v593_v23 = vld [vmem:[#allocation2 + $0xc4] ss:$8 sps:$4 sm:$0xff]   ;;  %v566_v24 = vld [vmem:[#allocation2 + $0x74] ss:$8 sps:$4 sm:$0xff]   ;;  %v568_v25 = vld [vmem:[#allocation2 + $0x70] ss:$8 sps:$4 sm:$0xff]  }
  0x1b   :  { %323 = vmatpush1.bf16.msra.mxu1 %v577_v13  ;;  %v29_v26 = vld [vmem:[%s716_s0] sm:$0xff]  ;;  %v599_v28 = vld [vmem:[#allocation2 + $0xd4] ss:$8 sps:$4 sm:$0xff]   ;;  %v601_v32 = vld [vmem:[#allocation2 + $0xd0] ss:$8 sps:$4 sm:$0xff]   ;;  %v90_v56 = vshrl.u32 %v89_v55, 7 }
  0x1c   :  { %324 = vmatprep.subr.bf16.mxu1 %v581_v16  ;;  %v595_v27 = vld [vmem:[#allocation2 + $0xc0] ss:$8 sps:$4 sm:$0xff]   ;;  %v574_v29 = vld [vmem:[#allocation2 + $0x104] ss:$8 sps:$4 sm:$0xff]   ;;  %v32_v30 = vpack.c.bf16 %v29_v26, %v29_v26  ;;  %v580_v34 = vld [vmem:[#allocation2 + $0x114] ss:$8 sps:$4 sm:$0xff]  }
  0x1d   :  { %204 = vmatpush1.bf16.msra.mxu0 %v553_v6  ;;  %v572_v31 = vld [vmem:[#allocation2 + $0x100] ss:$8 sps:$4 sm:$0xff]   ;;  %v605_v33 = vld [vmem:[#allocation2 + $0xe4] ss:$8 sps:$4 sm:$0xff]   ;;  %v578_v36 = vld [vmem:[#allocation2 + $0x110] ss:$8 sps:$4 sm:$0xff]  }
  0x1e   :  { %205 = vmatprep.subr.bf16.mxu0 %v554_v7  ;;  %v607_v35 = vld [vmem:[#allocation2 + $0xe0] ss:$8 sps:$4 sm:$0xff]   ;;  %v611_v37 = vld [vmem:[#allocation2 + $0xf4] ss:$8 sps:$4 sm:$0xff]   ;;  %v586_v38 = vld [vmem:[#allocation2 + $0x124] ss:$8 sps:$4 sm:$0xff]  }
  0x1f   :  { %325 = vmatpush1.bf16.msra.mxu1 %v583_v18  ;;  %v613_v39 = vld [vmem:[#allocation2 + $0xf0] ss:$8 sps:$4 sm:$0xff]   ;;  %v30_v40 = vld [vmem:[%s716_s0 + $0x8] sm:$0xff]  ;;  %v592_v42 = vld [vmem:[#allocation2 + $0x134] ss:$8 sps:$4 sm:$0xff]   ;;  %v91_v57 = vsub.s32 0, %v90_v56 }
  0x20   :  { %326 = vmatprep.subr.bf16.mxu1 %v587_v19  ;;  %v584_v41 = vld [vmem:[#allocation2 + $0x120] ss:$8 sps:$4 sm:$0xff]   ;;  %v33_v43 = vpack.c.bf16 %v30_v40, %v30_v40  ;;  %v590_v44 = vld [vmem:[#allocation2 + $0x130] ss:$8 sps:$4 sm:$0xff]   ;;  %v598_v45 = vld [vmem:[#allocation2 + $0x144] ss:$8 sps:$4 sm:$0xff]  }
  0x21   :  { %206 = vmatpush1.bf16.msra.mxu0 %v556_v8  ;;  %v596_v46 = vld [vmem:[#allocation2 + $0x140] ss:$8 sps:$4 sm:$0xff]   ;;  %v604_v47 = vld [vmem:[#allocation2 + $0x154] ss:$8 sps:$4 sm:$0xff]   ;;  %v602_v48 = vld [vmem:[#allocation2 + $0x150] ss:$8 sps:$4 sm:$0xff]  }
  0x22   :  { %207 = vmatprep.subr.bf16.mxu0 %v557_v11  ;;  %v610_v49 = vld [vmem:[#allocation2 + $0x164] ss:$8 sps:$4 sm:$0xff]   ;;  %v608_v50 = vld [vmem:[#allocation2 + $0x160] ss:$8 sps:$4 sm:$0xff]   ;;  %v616_v51 = vld [vmem:[#allocation2 + $0x174] ss:$8 sps:$4 sm:$0xff]  }
  0x23   :  { %327 = vmatpush1.bf16.msra.mxu1 %v589_v22  ;;  %v614_v52 = vld [vmem:[#allocation2 + $0x170] ss:$8 sps:$4 sm:$0xff]   ;;  %v83_v58 = vld [vmem:[%s718_s2] sm:$0x3]  ;;  %v95_v59 = vsub.s32 1, %v90_v56 }
  0x24   :  { %328 = vmatprep.subr.bf16.mxu1 %v593_v23  ;;  %v92_v60 = vrot.slane %v83_v58, %v91_v57  ;;  %v84_v4 = vld [vmem:[%s718_s2 + $0x2] sm:$0x3]  ;;  %v85_v13 = vld [vmem:[%s718_s2 + $0x4] sm:$0x3] }
  0x25   :  { %208 = vmatpush1.bf16.msra.mxu0 %v559_v14  ;;  %v96_v61 = vrot.slane %v83_v58, %v95_v59  ;;  %v100_v5 = vrot.slane %v84_v4, %v91_v57  ;;  %v104_v6 = vrot.slane %v84_v4, %v95_v59  ;;  %v108_v14 = vrot.slane %v85_v13, %v91_v57 }
  0x26   :  { %209 = vmatprep.subr.bf16.mxu0 %v560_v15  ;;  %v112_v15 = vrot.slane %v85_v13, %v95_v59 }
  0x27   :  { %329 = vmatpush1.bf16.msra.mxu1 %v595_v27 }
  0x28   :  { %330 = vmatprep.subr.bf16.mxu1 %v599_v28 }
  0x29   :  { %210 = vmatpush1.bf16.msra.mxu0 %v562_v17 }
  0x2a   :  { %211 = vmatprep.subr.bf16.mxu0 %v563_v20 }
  0x2b   :  { %331 = vmatpush1.bf16.msra.mxu1 %v601_v32 }
  0x2c   :  { %332 = vmatprep.subr.bf16.mxu1 %v605_v33 }
  0x2d   :  { %212 = vmatpush1.bf16.msra.mxu0 %v565_v21 }
  0x2e   :  { %213 = vmatprep.subr.bf16.mxu0 %v566_v24 }
  0x2f   :  { %333 = vmatpush1.bf16.msra.mxu1 %v607_v35 }
  0x30   :  { %334 = vmatprep.subr.bf16.mxu1 %v611_v37 }
  0x31   :  { %214 = vmatpush1.bf16.msra.mxu0 %v568_v25 }
  0x32   :  { %441 = vmatprep.subr.bf16.mxu0 %v574_v29 }
  0x33   :  { %335 = vmatpush1.bf16.msra.mxu1 %v613_v39 }
  0x34   :  { %232 = vmatmul.mubr.bf16.vlgmr.msra.gmra.mrb[0].mxu0 %v32_v30 }
  0x35   :  { %442 = vmatpush1.bf16.msra.mxu0 %v572_v31  ;;  %473 = vmatprep.mubr.bf16.mxu0 %v644_v0 }
  0x36   :  { %443 = vmatprep.subr.bf16.mxu0 %v580_v34  ;;  %353 = vmatmul.mubr.bf16.vlgmr.msra.gmra.mrb[0].mxu1 %v33_v43 }
  0x39   :  { %444 = vmatpush1.bf16.msra.mxu0 %v578_v36 }
  0x3a   :  { %445 = vmatprep.subr.bf16.mxu0 %v586_v38 }
  0x3d   :  { %446 = vmatpush1.bf16.msra.mxu0 %v584_v41 }
  0x3e   :  { %447 = vmatprep.subr.bf16.mxu0 %v592_v42 }
  0x41   :  { %448 = vmatpush1.bf16.msra.mxu0 %v590_v44 }
  0x42   :  { %449 = vmatprep.subr.bf16.mxu0 %v598_v45 }
  0x45   :  { %450 = vmatpush1.bf16.msra.mxu0 %v596_v46 }
  0x46   :  { %451 = vmatprep.subr.bf16.mxu0 %v604_v47 }
  0x49   :  { %452 = vmatpush1.bf16.msra.mxu0 %v602_v48 }
  0x4a   :  { %453 = vmatprep.subr.bf16.mxu0 %v610_v49 }
  0x4d   :  { %454 = vmatpush1.bf16.msra.mxu0 %v608_v50 }
  0x4e   :  { %455 = vmatprep.subr.bf16.mxu0 %v616_v51 }
  0x51   :  { %456 = vmatpush1.bf16.msra.mxu0 %v614_v52 }
  0x54   :  { %474 = vmatmul.mubr.bf16.vlgmr.msra.gmra.mrb[4].mxu0 %v34_v54 }
 0x107   :  { %v233_v62 = vpop.f32.mrb[0].mxu0 }
 0x108   :  { %v234_v63 = vadd.f32 %v233_v62, %v92_v60  ;;  %v235_v0 = vpop.f32.mrb[1].mxu0 }
 0x109   :  { %v236_v1 = vadd.f32 %v235_v0, %v96_v61  ;;  %v237_v2 = vpop.f32.mrb[2].mxu0  ;;  %v354_v7 = vpop.f32.mrb[0].mxu1 }
 0x10a   :  { %482 = vst [vmem:[%s719_s3] sm:$0xff] %v234_v63  ;;  %v238_v3 = vpop.f32.mrb[3].mxu0  ;;  %v355_v8 = vadd.f32 %v354_v7, %v100_v5  ;;  %v356_v9 = vpop.f32.mrb[1].mxu1 }
 0x10b   :  { %483 = vst [vmem:[%s719_s3 + $0x8] sm:$0xff] %v236_v1  ;;  %v357_v10 = vadd.f32 %v356_v9, %v104_v6  ;;  %v358_v11 = vpop.f32.mrb[2].mxu1 }
 0x10c   :  { %484 = vst [vmem:[%s719_s3 + $0x10] sm:$0xff] %v355_v8  ;;  %v359_v12 = vpop.f32.mrb[3].mxu1 }
 0x10d   :  { %485 = vst [vmem:[%s719_s3 + $0x18] sm:$0xff] %v357_v10 }
 0x127   :  { %v475_v16 = vpop.f32.mrb[4].mxu0 }
 0x128   :  { %v476_v17 = vadd.f32 %v475_v16, %v108_v14  ;;  %v477_v18 = vpop.f32.mrb[5].mxu0 }
 0x129   :  { %v478_v19 = vadd.f32 %v477_v18, %v112_v15  ;;  %v479_v20 = vpop.f32.mrb[6].mxu0 }
 0x12a   :  { %486 = vst [vmem:[%s719_s3 + $0x20] sm:$0xff] %v476_v17  ;;  %v480_v21 = vpop.f32.mrb[7].mxu0 }
 0x12b   :  { %487 = vst [vmem:[%s719_s3 + $0x28] sm:$0xff] %v478_v19 }
 0x12c   :  { %492 = vsyncpa [#allocation3], 1 }

</bundles_post_ra>
